<compile_context>
chip_gen: v7x
topology: tpu7x:2x2x1
jax: 0.10.0
libtpu: 0.0.40
codegen_flags: <defaults>
</compile_context>

<pallas_src>
import functools
import math

import jax
import jax.numpy as jnp
from jax import lax
from jax.experimental import pallas as pl
from jax.experimental.pallas import tpu as pltpu

NEGATIVE_SLOPE = 1.0

LANE = 128                 # lanes per vreg
STRIP = 8                  # sublane strip: one f32 vreg per input plane
MAX_ROWS_PER_STEP = 512    # 512*128 = 65536 pixels per grid step (~0.75 MiB/plane-set)
ROW_ALIGN = 64             # keeps n_strips a multiple of the unroll factor


def _cdiv(a, b):
    return -(-a // b)


def _round_up(a, b):
    return _cdiv(a, b) * b


def _fused_kernel(x_ref, w_ref, b_ref, o_ref, *, cout, cin, n_full, rem, unroll):
    """x_ref: (cin, rows_per_step, 128) f32 pixel planes (one hw block, one batch elem).
    w_ref: (cout, cin) f32 in SMEM.   b_ref: (cout,) f32 in SMEM.
    o_ref: (1, 128) f32 lane-dense partial sums for this (batch, hw-block)."""
    # Hoist the cout*cin weight scalars + cout biases out of the strip loop.
    w_s = [[w_ref[c, k] for k in range(cin)] for c in range(cout)]
    b_s = [b_ref[c] for c in range(cout)]

    def channel_relu_sum(planes):
        # sum_c relu(sum_k w[c,k]*plane_k + b[c]); first channel seeds the acc
        # (no zero-init add), remaining channels add directly into it.
        acc = None
        for c in range(cout):                      # static unroll (cout = 8)
            y = planes[0] * w_s[c][0]
            for k in range(1, cin):                # static unroll (cin = 3)
                y = y + planes[k] * w_s[c][k]
            y = y + b_s[c]
            r = jnp.maximum(y, 0.0)                # relu; scale folded outside
            acc = r if acc is None else acc + r
        return acc

    pieces = []

    if n_full > 0:
        if n_full == 1:
            planes = [x_ref[k, pl.ds(0, STRIP), :] for k in range(cin)]
            tot = channel_relu_sum(planes)
        else:
            def strip_body(s, carry):
                base = pl.multiple_of(s * STRIP, STRIP)
                planes = [x_ref[k, pl.ds(base, STRIP), :] for k in range(cin)]
                return carry + channel_relu_sum(planes)

            tot = lax.fori_loop(0, n_full, strip_body,
                                jnp.zeros((STRIP, LANE), jnp.float32),
                                unroll=unroll)
        pieces.append(jnp.sum(tot, axis=0, keepdims=True))

    if rem > 0:
        base = n_full * STRIP                      # static Python int
        planes = [x_ref[k, pl.ds(base, rem), :] for k in range(cin)]
        pieces.append(jnp.sum(channel_relu_sum(planes), axis=0, keepdims=True))

    out = pieces[0]
    for p in pieces[1:]:
        out = out + p
    o_ref[...] = out                               # lane-dense (1,128) store


def model_forward(x_nchw, weight, bias, negative_slope=NEGATIVE_SLOPE):
    """x_nchw: (N, 3, H, W) f32, weight: (Cout, Cin, 1, 1), bias: (Cout,).
    Returns sum(where(conv(x) > 0, -negative_slope*conv(x), 0) / 0.5)."""
    n, cin, h, w_dim = x_nchw.shape
    cout = weight.shape[0]
    # Analytic border/pad correction below is valid ONLY for 1x1 kernel,
    # stride 1, zero spatial padding of 1, and zero-filled lane padding.
    assert weight.shape[1] == cin and weight.shape[2:] == (1, 1)
    hw = h * w_dim

    # Pixel tiling: pixels on the lane axis, 'rows' on the sublane axis.
    rows_data = _cdiv(hw, LANE)
    if rows_data <= MAX_ROWS_PER_STEP:
        rows_per_step = rows_data                  # single block (full-dim rows)
        grid_out = 1
    else:
        grid_out = _cdiv(rows_data, MAX_ROWS_PER_STEP)
        rows_per_step = _round_up(_cdiv(rows_data, grid_out), ROW_ALIGN)
    rows_total = grid_out * rows_per_step
    hw_pad = rows_total * LANE

    x3 = x_nchw.reshape(n, cin, hw).astype(jnp.float32)
    if hw_pad != hw:
        # Ragged shapes only; padded pixels are zero and their relu(bias)
        # contribution is removed analytically below (no in-kernel masking).
        x3 = jnp.pad(x3, ((0, 0), (0, 0), (0, hw_pad - hw)))
    x4 = x3.reshape(n, cin, rows_total, LANE)      # lane-dense pixel layout

    w_mat = weight.reshape(cout, cin).astype(jnp.float32)
    b_vec = bias.reshape(cout).astype(jnp.float32)

    n_full, rem = divmod(rows_per_step, STRIP)
    unroll = math.gcd(n_full, 8) if n_full > 16 else True

    kernel = functools.partial(_fused_kernel, cout=cout, cin=cin,
                               n_full=n_full, rem=rem, unroll=unroll)

    cost = pl.CostEstimate(
        flops=2 * n * rows_total * LANE * cout * cin,
        transcendentals=0,
        bytes_accessed=(n * cin * rows_total * LANE + n * grid_out * LANE) * 4,
    )

    partials = pl.pallas_call(
        kernel,
        out_shape=jax.ShapeDtypeStruct((n, grid_out, 1, LANE), jnp.float32),
        grid_spec=pltpu.PrefetchScalarGridSpec(
            num_scalar_prefetch=0,
            grid=(n, grid_out),
            in_specs=[
                pl.BlockSpec((None, cin, rows_per_step, LANE),
                             lambda b, jo: (b, 0, jo, 0)),
                pl.BlockSpec(memory_space=pltpu.MemorySpace.SMEM),   # weights
                pl.BlockSpec(memory_space=pltpu.MemorySpace.SMEM),   # bias
            ],
            out_specs=pl.BlockSpec((None, None, 1, LANE),
                                   lambda b, jo: (b, jo, 0, 0)),
        ),
        compiler_params=pltpu.CompilerParams(
            dimension_semantics=("parallel", "parallel")),
        cost_estimate=cost,
    )(x4, w_mat, b_vec)

    # Closed-form corrections + final scale, applied once on the scalar:
    #  * conv padding=1 border pixels each contribute sum_c relu(bias_c),
    #  * lane/row zero-padding pixels (counted by the kernel) contribute the
    #    same and are subtracted,
    #  * where(v>0, -slope*v, 0)/0.5 == (-2*slope) * relu(v).
    relu_bias_sum = jnp.sum(jnp.maximum(b_vec, 0.0))
    border_and_pad = n * ((h + 2) * (w_dim + 2) - hw_pad)
    scale = -2.0 * float(negative_slope)
    return scale * (jnp.sum(partials) + border_and_pad * relu_bias_sum)


def _reference(x_nchw, weight, bias, negative_slope=NEGATIVE_SLOPE):
    # Pure-JAX reference of the PyTorch module.
    x_pad = jnp.pad(x_nchw, ((0, 0), (0, 0), (1, 1), (1, 1)))
    w_mat = weight.reshape(weight.shape[0], weight.shape[1])  # (Cout, Cin)
    v1 = jnp.einsum("nchw,oc->nohw", x_pad, w_mat) + bias[None, :, None, None]
    v3 = jnp.where(v1 > 0, v1 * (-negative_slope), 0.0)
    return jnp.sum(v3 / 0.5)


if __name__ == "__main__":
    key = jax.random.PRNGKey(0)
    kx, kw, kb = jax.random.split(key, 3)

    # Small shapes consistent with Conv2d(3, 8, 1, stride=1, padding=1).
    n, cin, h, w_dim, cout = 2, 3, 16, 16, 8
    x1 = jax.random.normal(kx, (n, cin, h, w_dim), dtype=jnp.float32)

    # Deterministic synthetic parameters (Conv2d-like uniform init scale).
    bound = 1.0 / (cin ** 0.5)
    weight = jax.random.uniform(
        kw, (cout, cin, 1, 1), minval=-bound, maxval=bound, dtype=jnp.float32
    )
    bias = jax.random.uniform(
        kb, (cout,), minval=-bound, maxval=bound, dtype=jnp.float32
    )

    out = model_forward(x1, weight, bias, NEGATIVE_SLOPE)
    out = jax.block_until_ready(out)

    ref = _reference(x1, weight, bias, NEGATIVE_SLOPE)
    assert jnp.allclose(out, ref, rtol=1e-4, atol=1e-2), (out, ref)

    print("KERNEL_OK")
</pallas_src>

<mosaic_0001>
module attributes {stable_mosaic.version = 11 : i64} {
  func.func @_fused_kernel(%arg0: i32, %arg1: i32, %arg2: memref<1x3x2x128xf32, #tpu.memory_space<vmem>>, %arg3: memref<8x3xf32, #tpu.memory_space<smem>>, %arg4: memref<8xf32, #tpu.memory_space<smem>>, %arg5: memref<1x1x1x128xf32, #tpu.memory_space<vmem>>) attributes {dimension_semantics = [#tpu.dimension_semantics<parallel>, #tpu.dimension_semantics<parallel>], iteration_bounds = array<i64: 2, 1>, scalar_prefetch = 0 : i64, scratch_operands = 0 : i64, tpu.core_type = #tpu.core_type<tc>, window_params = [{transform_indices = @transform_0, window_bounds = array<i64: 1, 3, 2, 128>}, {transform_indices = @transform_1, window_bounds = array<i64: 8, 3>}, {transform_indices = @transform_2, window_bounds = array<i64: 8>}, {transform_indices = @transform_3, window_bounds = array<i64: 1, 1, 1, 128>}]} {
    %c0 = arith.constant 0 : index
    %c0_0 = arith.constant 0 : index
    %0 = memref.load %arg3[%c0, %c0_0] : memref<8x3xf32, #tpu.memory_space<smem>>
    %c0_1 = arith.constant 0 : index
    %c1 = arith.constant 1 : index
    %1 = memref.load %arg3[%c0_1, %c1] : memref<8x3xf32, #tpu.memory_space<smem>>
    %c0_2 = arith.constant 0 : index
    %c2 = arith.constant 2 : index
    %2 = memref.load %arg3[%c0_2, %c2] : memref<8x3xf32, #tpu.memory_space<smem>>
    %c1_3 = arith.constant 1 : index
    %c0_4 = arith.constant 0 : index
    %3 = memref.load %arg3[%c1_3, %c0_4] : memref<8x3xf32, #tpu.memory_space<smem>>
    %c1_5 = arith.constant 1 : index
    %c1_6 = arith.constant 1 : index
    %4 = memref.load %arg3[%c1_5, %c1_6] : memref<8x3xf32, #tpu.memory_space<smem>>
    %c1_7 = arith.constant 1 : index
    %c2_8 = arith.constant 2 : index
    %5 = memref.load %arg3[%c1_7, %c2_8] : memref<8x3xf32, #tpu.memory_space<smem>>
    %c2_9 = arith.constant 2 : index
    %c0_10 = arith.constant 0 : index
    %6 = memref.load %arg3[%c2_9, %c0_10] : memref<8x3xf32, #tpu.memory_space<smem>>
    %c2_11 = arith.constant 2 : index
    %c1_12 = arith.constant 1 : index
    %7 = memref.load %arg3[%c2_11, %c1_12] : memref<8x3xf32, #tpu.memory_space<smem>>
    %c2_13 = arith.constant 2 : index
    %c2_14 = arith.constant 2 : index
    %8 = memref.load %arg3[%c2_13, %c2_14] : memref<8x3xf32, #tpu.memory_space<smem>>
    %c3 = arith.constant 3 : index
    %c0_15 = arith.constant 0 : index
    %9 = memref.load %arg3[%c3, %c0_15] : memref<8x3xf32, #tpu.memory_space<smem>>
    %c3_16 = arith.constant 3 : index
    %c1_17 = arith.constant 1 : index
    %10 = memref.load %arg3[%c3_16, %c1_17] : memref<8x3xf32, #tpu.memory_space<smem>>
    %c3_18 = arith.constant 3 : index
    %c2_19 = arith.constant 2 : index
    %11 = memref.load %arg3[%c3_18, %c2_19] : memref<8x3xf32, #tpu.memory_space<smem>>
    %c4 = arith.constant 4 : index
    %c0_20 = arith.constant 0 : index
    %12 = memref.load %arg3[%c4, %c0_20] : memref<8x3xf32, #tpu.memory_space<smem>>
    %c4_21 = arith.constant 4 : index
    %c1_22 = arith.constant 1 : index
    %13 = memref.load %arg3[%c4_21, %c1_22] : memref<8x3xf32, #tpu.memory_space<smem>>
    %c4_23 = arith.constant 4 : index
    %c2_24 = arith.constant 2 : index
    %14 = memref.load %arg3[%c4_23, %c2_24] : memref<8x3xf32, #tpu.memory_space<smem>>
    %c5 = arith.constant 5 : index
    %c0_25 = arith.constant 0 : index
    %15 = memref.load %arg3[%c5, %c0_25] : memref<8x3xf32, #tpu.memory_space<smem>>
    %c5_26 = arith.constant 5 : index
    %c1_27 = arith.constant 1 : index
    %16 = memref.load %arg3[%c5_26, %c1_27] : memref<8x3xf32, #tpu.memory_space<smem>>
    %c5_28 = arith.constant 5 : index
    %c2_29 = arith.constant 2 : index
    %17 = memref.load %arg3[%c5_28, %c2_29] : memref<8x3xf32, #tpu.memory_space<smem>>
    %c6 = arith.constant 6 : index
    %c0_30 = arith.constant 0 : index
    %18 = memref.load %arg3[%c6, %c0_30] : memref<8x3xf32, #tpu.memory_space<smem>>
    %c6_31 = arith.constant 6 : index
    %c1_32 = arith.constant 1 : index
    %19 = memref.load %arg3[%c6_31, %c1_32] : memref<8x3xf32, #tpu.memory_space<smem>>
    %c6_33 = arith.constant 6 : index
    %c2_34 = arith.constant 2 : index
    %20 = memref.load %arg3[%c6_33, %c2_34] : memref<8x3xf32, #tpu.memory_space<smem>>
    %c7 = arith.constant 7 : index
    %c0_35 = arith.constant 0 : index
    %21 = memref.load %arg3[%c7, %c0_35] : memref<8x3xf32, #tpu.memory_space<smem>>
    %c7_36 = arith.constant 7 : index
    %c1_37 = arith.constant 1 : index
    %22 = memref.load %arg3[%c7_36, %c1_37] : memref<8x3xf32, #tpu.memory_space<smem>>
    %c7_38 = arith.constant 7 : index
    %c2_39 = arith.constant 2 : index
    %23 = memref.load %arg3[%c7_38, %c2_39] : memref<8x3xf32, #tpu.memory_space<smem>>
    %c0_40 = arith.constant 0 : index
    %24 = memref.load %arg4[%c0_40] : memref<8xf32, #tpu.memory_space<smem>>
    %c1_41 = arith.constant 1 : index
    %25 = memref.load %arg4[%c1_41] : memref<8xf32, #tpu.memory_space<smem>>
    %c2_42 = arith.constant 2 : index
    %26 = memref.load %arg4[%c2_42] : memref<8xf32, #tpu.memory_space<smem>>
    %c3_43 = arith.constant 3 : index
    %27 = memref.load %arg4[%c3_43] : memref<8xf32, #tpu.memory_space<smem>>
    %c4_44 = arith.constant 4 : index
    %28 = memref.load %arg4[%c4_44] : memref<8xf32, #tpu.memory_space<smem>>
    %c5_45 = arith.constant 5 : index
    %29 = memref.load %arg4[%c5_45] : memref<8xf32, #tpu.memory_space<smem>>
    %c6_46 = arith.constant 6 : index
    %30 = memref.load %arg4[%c6_46] : memref<8xf32, #tpu.memory_space<smem>>
    %c7_47 = arith.constant 7 : index
    %31 = memref.load %arg4[%c7_47] : memref<8xf32, #tpu.memory_space<smem>>
    %c0_48 = arith.constant 0 : index
    %c0_49 = arith.constant 0 : index
    %c0_50 = arith.constant 0 : index
    %c0_51 = arith.constant 0 : index
    %32 = vector.load %arg2[%c0_48, %c0_49, %c0_50, %c0_51] : memref<1x3x2x128xf32, #tpu.memory_space<vmem>>, vector<1x1x2x128xf32>
    %33 = vector.shape_cast %32 : vector<1x1x2x128xf32> to vector<2x128xf32>
    %c0_52 = arith.constant 0 : index
    %c1_53 = arith.constant 1 : index
    %c0_54 = arith.constant 0 : index
    %c0_55 = arith.constant 0 : index
    %34 = vector.load %arg2[%c0_52, %c1_53, %c0_54, %c0_55] : memref<1x3x2x128xf32, #tpu.memory_space<vmem>>, vector<1x1x2x128xf32>
    %35 = vector.shape_cast %34 : vector<1x1x2x128xf32> to vector<2x128xf32>
    %c0_56 = arith.constant 0 : index
    %c2_57 = arith.constant 2 : index
    %c0_58 = arith.constant 0 : index
    %c0_59 = arith.constant 0 : index
    %36 = vector.load %arg2[%c0_56, %c2_57, %c0_58, %c0_59] : memref<1x3x2x128xf32, #tpu.memory_space<vmem>>, vector<1x1x2x128xf32>
    %37 = vector.shape_cast %36 : vector<1x1x2x128xf32> to vector<2x128xf32>
    %38 = vector.broadcast %0 : f32 to vector<2x128xf32>
    %39 = arith.mulf %33, %38 : vector<2x128xf32>
    %40 = vector.broadcast %1 : f32 to vector<2x128xf32>
    %41 = arith.mulf %35, %40 : vector<2x128xf32>
    %42 = arith.addf %39, %41 : vector<2x128xf32>
    %43 = vector.broadcast %2 : f32 to vector<2x128xf32>
    %44 = arith.mulf %37, %43 : vector<2x128xf32>
    %45 = arith.addf %42, %44 : vector<2x128xf32>
    %46 = vector.broadcast %24 : f32 to vector<2x128xf32>
    %47 = arith.addf %45, %46 : vector<2x128xf32>
    %cst = arith.constant 0.000000e+00 : f32
    %48 = vector.broadcast %cst : f32 to vector<2x128xf32>
    %49 = arith.maximumf %47, %48 : vector<2x128xf32>
    %50 = vector.broadcast %3 : f32 to vector<2x128xf32>
    %51 = arith.mulf %33, %50 : vector<2x128xf32>
    %52 = vector.broadcast %4 : f32 to vector<2x128xf32>
    %53 = arith.mulf %35, %52 : vector<2x128xf32>
    %54 = arith.addf %51, %53 : vector<2x128xf32>
    %55 = vector.broadcast %5 : f32 to vector<2x128xf32>
    %56 = arith.mulf %37, %55 : vector<2x128xf32>
    %57 = arith.addf %54, %56 : vector<2x128xf32>
    %58 = vector.broadcast %25 : f32 to vector<2x128xf32>
    %59 = arith.addf %57, %58 : vector<2x128xf32>
    %cst_60 = arith.constant 0.000000e+00 : f32
    %60 = vector.broadcast %cst_60 : f32 to vector<2x128xf32>
    %61 = arith.maximumf %59, %60 : vector<2x128xf32>
    %62 = arith.addf %49, %61 : vector<2x128xf32>
    %63 = vector.broadcast %6 : f32 to vector<2x128xf32>
    %64 = arith.mulf %33, %63 : vector<2x128xf32>
    %65 = vector.broadcast %7 : f32 to vector<2x128xf32>
    %66 = arith.mulf %35, %65 : vector<2x128xf32>
    %67 = arith.addf %64, %66 : vector<2x128xf32>
    %68 = vector.broadcast %8 : f32 to vector<2x128xf32>
    %69 = arith.mulf %37, %68 : vector<2x128xf32>
    %70 = arith.addf %67, %69 : vector<2x128xf32>
    %71 = vector.broadcast %26 : f32 to vector<2x128xf32>
    %72 = arith.addf %70, %71 : vector<2x128xf32>
    %cst_61 = arith.constant 0.000000e+00 : f32
    %73 = vector.broadcast %cst_61 : f32 to vector<2x128xf32>
    %74 = arith.maximumf %72, %73 : vector<2x128xf32>
    %75 = arith.addf %62, %74 : vector<2x128xf32>
    %76 = vector.broadcast %9 : f32 to vector<2x128xf32>
    %77 = arith.mulf %33, %76 : vector<2x128xf32>
    %78 = vector.broadcast %10 : f32 to vector<2x128xf32>
    %79 = arith.mulf %35, %78 : vector<2x128xf32>
    %80 = arith.addf %77, %79 : vector<2x128xf32>
    %81 = vector.broadcast %11 : f32 to vector<2x128xf32>
    %82 = arith.mulf %37, %81 : vector<2x128xf32>
    %83 = arith.addf %80, %82 : vector<2x128xf32>
    %84 = vector.broadcast %27 : f32 to vector<2x128xf32>
    %85 = arith.addf %83, %84 : vector<2x128xf32>
    %cst_62 = arith.constant 0.000000e+00 : f32
    %86 = vector.broadcast %cst_62 : f32 to vector<2x128xf32>
    %87 = arith.maximumf %85, %86 : vector<2x128xf32>
    %88 = arith.addf %75, %87 : vector<2x128xf32>
    %89 = vector.broadcast %12 : f32 to vector<2x128xf32>
    %90 = arith.mulf %33, %89 : vector<2x128xf32>
    %91 = vector.broadcast %13 : f32 to vector<2x128xf32>
    %92 = arith.mulf %35, %91 : vector<2x128xf32>
    %93 = arith.addf %90, %92 : vector<2x128xf32>
    %94 = vector.broadcast %14 : f32 to vector<2x128xf32>
    %95 = arith.mulf %37, %94 : vector<2x128xf32>
    %96 = arith.addf %93, %95 : vector<2x128xf32>
    %97 = vector.broadcast %28 : f32 to vector<2x128xf32>
    %98 = arith.addf %96, %97 : vector<2x128xf32>
    %cst_63 = arith.constant 0.000000e+00 : f32
    %99 = vector.broadcast %cst_63 : f32 to vector<2x128xf32>
    %100 = arith.maximumf %98, %99 : vector<2x128xf32>
    %101 = arith.addf %88, %100 : vector<2x128xf32>
    %102 = vector.broadcast %15 : f32 to vector<2x128xf32>
    %103 = arith.mulf %33, %102 : vector<2x128xf32>
    %104 = vector.broadcast %16 : f32 to vector<2x128xf32>
    %105 = arith.mulf %35, %104 : vector<2x128xf32>
    %106 = arith.addf %103, %105 : vector<2x128xf32>
    %107 = vector.broadcast %17 : f32 to vector<2x128xf32>
    %108 = arith.mulf %37, %107 : vector<2x128xf32>
    %109 = arith.addf %106, %108 : vector<2x128xf32>
    %110 = vector.broadcast %29 : f32 to vector<2x128xf32>
    %111 = arith.addf %109, %110 : vector<2x128xf32>
    %cst_64 = arith.constant 0.000000e+00 : f32
    %112 = vector.broadcast %cst_64 : f32 to vector<2x128xf32>
    %113 = arith.maximumf %111, %112 : vector<2x128xf32>
    %114 = arith.addf %101, %113 : vector<2x128xf32>
    %115 = vector.broadcast %18 : f32 to vector<2x128xf32>
    %116 = arith.mulf %33, %115 : vector<2x128xf32>
    %117 = vector.broadcast %19 : f32 to vector<2x128xf32>
    %118 = arith.mulf %35, %117 : vector<2x128xf32>
    %119 = arith.addf %116, %118 : vector<2x128xf32>
    %120 = vector.broadcast %20 : f32 to vector<2x128xf32>
    %121 = arith.mulf %37, %120 : vector<2x128xf32>
    %122 = arith.addf %119, %121 : vector<2x128xf32>
    %123 = vector.broadcast %30 : f32 to vector<2x128xf32>
    %124 = arith.addf %122, %123 : vector<2x128xf32>
    %cst_65 = arith.constant 0.000000e+00 : f32
    %125 = vector.broadcast %cst_65 : f32 to vector<2x128xf32>
    %126 = arith.maximumf %124, %125 : vector<2x128xf32>
    %127 = arith.addf %114, %126 : vector<2x128xf32>
    %128 = vector.broadcast %21 : f32 to vector<2x128xf32>
    %129 = arith.mulf %33, %128 : vector<2x128xf32>
    %130 = vector.broadcast %22 : f32 to vector<2x128xf32>
    %131 = arith.mulf %35, %130 : vector<2x128xf32>
    %132 = arith.addf %129, %131 : vector<2x128xf32>
    %133 = vector.broadcast %23 : f32 to vector<2x128xf32>
    %134 = arith.mulf %37, %133 : vector<2x128xf32>
    %135 = arith.addf %132, %134 : vector<2x128xf32>
    %136 = vector.broadcast %31 : f32 to vector<2x128xf32>
    %137 = arith.addf %135, %136 : vector<2x128xf32>
    %cst_66 = arith.constant 0.000000e+00 : f32
    %138 = vector.broadcast %cst_66 : f32 to vector<2x128xf32>
    %139 = arith.maximumf %137, %138 : vector<2x128xf32>
    %140 = arith.addf %127, %139 : vector<2x128xf32>
    %cst_67 = arith.constant dense<0.000000e+00> : vector<128xf32>
    %141 = vector.multi_reduction <add>, %140, %cst_67 [0] : vector<2x128xf32> to vector<128xf32>
    %142 = vector.shape_cast %141 : vector<128xf32> to vector<1x128xf32>
    %c0_68 = arith.constant 0 : index
    %c0_69 = arith.constant 0 : index
    %c0_70 = arith.constant 0 : index
    %c0_71 = arith.constant 0 : index
    %143 = vector.load %arg5[%c0_68, %c0_69, %c0_70, %c0_71] : memref<1x1x1x128xf32, #tpu.memory_space<vmem>>, vector<1x1x1x128xf32>
    %144 = vector.shape_cast %143 : vector<1x1x1x128xf32> to vector<1x128xf32>
    %145 = vector.shape_cast %142 : vector<1x128xf32> to vector<1x1x1x128xf32>
    tpu.vector_store %arg5[%c0_68, %c0_69, %c0_70, %c0_71], %145 {strides = array<i32>} : memref<1x1x1x128xf32, #tpu.memory_space<vmem>>, vector<1x1x1x128xf32>,
    return
  }
  func.func @transform_0(%arg0: i32, %arg1: i32) -> (i32, i32, i32, i32) {
    %c0_i32 = arith.constant 0 : i32
    %c0_i32_0 = arith.constant 0 : i32
    %c0_i32_1 = arith.constant 0 : i32
    return %arg0, %c0_i32, %arg1, %c0_i32_0 : i32, i32, i32, i32
  }
  func.func @transform_1(%arg0: i32, %arg1: i32) -> (i32, i32) {
    %c0_i32 = arith.constant 0 : i32
    %c0_i32_0 = arith.constant 0 : i32
    %c0_i32_1 = arith.constant 0 : i32
    return %c0_i32, %c0_i32_0 : i32, i32
  }
  func.func @transform_2(%arg0: i32, %arg1: i32) -> i32 {
    %c0_i32 = arith.constant 0 : i32
    %c0_i32_0 = arith.constant 0 : i32
    return %c0_i32 : i32
  }
  func.func @transform_3(%arg0: i32, %arg1: i32) -> (i32, i32, i32, i32) {
    %c0_i32 = arith.constant 0 : i32
    %c0_i32_0 = arith.constant 0 : i32
    %c0_i32_1 = arith.constant 0 : i32
    return %arg0, %arg1, %c0_i32, %c0_i32_0 : i32, i32, i32, i32
  }
}

</mosaic_0001>

<bundles_post_ra>
// kernel: tpu_custom_call.1
= control target key start
LH: loop header
LB: loop body
LE: loop exit
PB: predicated region body
PF: predicated region fallthrough
CT: control target
= control target key end

     0   :  { %8 = vsyncpa [#allocation4], 0  ;;  %s988_s0 = inlined_call_operand.vmem [shape: f32[2,3,2,128], index: 0, kind: input, shape index: {}]   ;;  %s989_s1 = inlined_call_operand.vmem [shape: f32[8,3], index: 1, kind: input, shape index: {}]   ;;  %s990_s2 = inlined_call_operand.vmem [shape: f32[8], index: 2, kind: input, shape index: {}]   ;;  %s991_s3 = inlined_call_operand.hbm [shape: f32[2,1,1,128], index: 3, kind: output, shape index: {}]  }
   0x1   :  { %9 = vsyncpa [#allocation6], 0 }
   0x2   :  { %10 = vsyncpa [#allocation3], 0 }
   0x3   :  { %12 = vsyncpa [#allocation3 + $0x1], 0  ;;  %s730_s12 = smov 0   ;;  %s732_s13 = smov 0  }
   0x4   :  { %s734_s14 = smov 0   ;;  %s736_s15 = smov 0  }
   0x5   :  { %s738_s16 = smov 0   ;;  %s740_s17 = smov 0  }
   0x6 LB: > { %s467_s18 = sadd.s32 4294967295, %s705_s17   ;;  %s468_s19 = sadd.s32 4294967294, %s705_s17   ;;  %s705_s17 = sphi %s740_s17, %s18_s17   ;;  %s701_s16 = sphi %s738_s16, %s1009_s16   ;;  %s697_s15 = sphi %s736_s15, %s1008_s15   ;;  %s693_s14 = sphi %s734_s14, %s1007_s14   ;;  %s689_s13 = sphi %s732_s13, %s1006_s13   ;;  %s685_s12 = sphi %s730_s12, %s1005_s12  }
   0x7   : > { %s30_s20 = sadd.s32 1, %s701_s16  ;;  %s109_s21 = sadd.s32 1, %s693_s14 }
   0x8   : > { %p32_p0 = scmp.ge.s32.totalorder %s30_s20, 2  ;;  %p119_p1 = scmp.ne.s32.totalorder %s693_s14, %s689_s13 }
   0x9   : > { %p120_p2 = scmp.eq.s32.totalorder %s467_s18, 1  ;;  %p125_p3 = scmp.ne.s32.totalorder %s689_s13, %s685_s12 }
   0xa   : > { %s1011_s20 = smov (%p32_p0, %s30_s20), 0  ;;  %p126_p5 = scmp.eq.s32.totalorder %s468_s19, 1 }
   0xb   : > { %p770_p4 = por %p120_p2, %p119_p1  ;;  %s104_s23 = ssub.s32 %s701_s16, %s1011_s20 }
   0xc   : > { %p469_p6 = scmp.ge.s32.totalorder %s705_s17, 1  ;;  %p107_p7 = scmp.eq.s32.totalorder %s104_s23, 0 }
   0xd   : > { %s996_s22 = scalar_select %p770_p4, 1, 0 }
   0xe   : > { %p777_p8 = por %p126_p5, %p125_p3  ;;  %p133_p9 = scmp.lt.s32.totalorder %s705_s17, 3 }
   0xf   : > { %s783_s25 = scalar_select %p107_p7, %s693_s14, %s109_s21  }
  0x10   : > { %s997_s24 = scalar_select %p777_p8, 1, 0 }
  0x11   : > { %p785_p10 = pnand %p469_p6, %p133_p9  ;;  %p789_p11 = scmp.eq.s32.totalorder %s467_s18, 0 }
  0x12   : > { %s146_s30 = sshll.u32 %s989_s1, 4  ;;  %s157_s6 = sshll.u32 %s990_s2, 4  ;;  %s147_s30 = int_to_ptr.vmem [resolvable:$true] %s146_s30  ;;  %s158_s6 = int_to_ptr.vmem [resolvable:$true] %s157_s6 }
  0x13   : > { %s998_s26 = scalar_select %p785_p10, 1, 0 }
  0x14   : > { %s999_s27 = scalar_select %p789_p11, 1, 0 }
  0x15   : > { %p523_p12 = pneg %p785_p10  ;;  %s589_s8 = scalar_lea.vmem %s147_s30, 128 }
  0x16   : > { %p590_p0 = scmp.ne.s32.totalorder %s147_s30, %s589_s8  ;;  %p597_p5 = scmp.lt.s32.totalorder %s147_s30, %s147_s30 }
  0x17   : > { %p803_p13 = pnand %p789_p11, %p523_p12  ;;  %p598_p6 = scmp.lt.s32.totalorder %s589_s8, %s589_s8 }
  0x19   : > { %p591_p1 = pneg %p803_p13  ;;  %p599_p7 = por %p598_p6, %p597_p5 }
  0x1b   : > { %p592_p2 = pnand %p591_p1, %p590_p0 }
  0x1d   : > { %p593_p3 = pneg %p592_p2 }
  0x1f   : > { %p600_p9 = pnand %p599_p7, %p593_p3 }
  0x21   : > { %603 = shalt.err (!%p600_p9)
}
  0x22   : > { %s707_s9 = smov [#allocation2]   ;;  %s604_s10 = scalar_lea.vmem %s158_s6, 16 }
  0x23   : > { %526 = dma.vmem_to_smem (!%p803_p13), %s147_s30, 128, %s707_s9, [#allocation4]  }
  0x24   : > { %p605_p12 = scmp.ne.s32.totalorder %s158_s6, %s604_s10  ;;  %p612_p11 = scmp.lt.s32.totalorder %s158_s6, %s158_s6 }
  0x25   : > { %p613_p10 = scmp.lt.s32.totalorder %s604_s10, %s604_s10 }
  0x26   : > { %p607_p8 = pnand %p605_p12, %p591_p1 }
  0x27   : > { %p614_p0 = por %p613_p10, %p612_p11 }
  0x28   : > { %p608_p4 = pneg %p607_p8 }
  0x2a   : > { %p615_p2 = pnand %p614_p0, %p608_p4 }
  0x2c   : > { %618 = shalt.err (!%p615_p2)
}
  0x2d   : > { %s708_s11 = smov [#allocation5]   ;;  %p1001_p3 = scmp.ne.s32.totalorder %s998_s26, 0 }
  0x2e   : > { %529 = dma.vmem_to_smem (!%p803_p13), %s158_s6, 16, %s708_s11, [#allocation6]  }
  0x2f   : > { %181 = sbr.rel (%p1001_p3) target bundleno = 126 (0x7e), region = 32  ;;  %p1002_p5 = scmp.ne.s32.totalorder (!%p1001_p3), %s999_s27, 0 }
  0x36   : > { %672 = dma.done.wait (%p1002_p5), [#allocation4], 128  }
  0x37   : > { %674 = vsyncadd (%p1002_p5), [#allocation4], 4294967168 }
  0x38   : > { %676 = dma.done.wait (%p1002_p5), [#allocation6], 16  }
  0x39   : > { %678 = vsyncadd (%p1002_p5), [#allocation6], 4294967280 }
  0x3a   : > { %191 = sfence }
  0x3b   : > { %p212_p4 = scmp.lt.s32.totalorder %s697_s15, 1  ;;  %s220_s18 = sld [smem:[#allocation2]]  ;;  %vm352_vm0 = vcmask 1041408  }
  0x3c   : > { %s477_s21 = sld [smem:[#allocation2 + $0x1]]  ;;  %s478_s23 = sld [smem:[#allocation2 + $0x2]] }
  0x3d   : > { %s213_s19 = scalar_select %p212_p4, %s697_s15, 1 }
  0x3e   : > { %s479_s28 = sld [smem:[#allocation2 + $0x80]]  ;;  %s480_s29 = sld [smem:[#allocation2 + $0x81]] }
  0x3f   : > { %s512_s26 = smul.u32 6, %s213_s19  ;;  %s481_s30 = sld [smem:[#allocation2 + $0x82]] }
  0x40   : > { %s828_s7 = sld [smem:[#allocation2 + $0x100]]  ;;  %s830_s27 = sld [smem:[#allocation2 + $0x101]] }
  0x41   : > { %s219_s6 = scalar_lea.vmem %s988_s0, %s512_s26  ;;  %s832_s8 = sld [smem:[#allocation2 + $0x102]]  ;;  %v257_v1 = vstv %s220_s18 }
  0x42   : > { %v834_v0 = vld [vmem:[%s219_s6] sm:$0x3]  ;;  %s836_s9 = sld [smem:[#allocation2 + $0x180]]  ;;  %s838_s10 = sld [smem:[#allocation2 + $0x181]]  ;;  %v840_v2 = vld [vmem:[%s219_s6 + $0x2] sm:$0x3]  ;;  %v259_v5 = vstv %s477_s21  ;;  %v262_v6 = vstv %s478_s23 }
  0x43   : > { %v258_v3 = vmul.f32 %v257_v1, %v834_v0  ;;  %s843_s11 = sld [smem:[#allocation2 + $0x182]]  ;;  %s845_s19 = sld [smem:[#allocation2 + $0x200]]  ;;  %v847_v4 = vld [vmem:[%s219_s6 + $0x4] sm:$0x3]  ;;  %v260_v7 = vmul.f32 %v840_v2, %v259_v5 }
  0x44   : > { %s849_s26 = sld [smem:[#allocation2 + $0x201]]  ;;  %s851_s18 = sld [smem:[#allocation2 + $0x202]]  ;;  %v263_v8 = vmul.f32 %v847_v4, %v262_v6  ;;  %v268_v9 = vstv %s479_s28  ;;  %v270_v11 = vstv %s480_s29 }
  0x45   : > { %s855_s4 = sld [smem:[#allocation2 + $0x280]]  ;;  %s857_s5 = sld [smem:[#allocation2 + $0x281]]  ;;  %v269_v10 = vmul.f32 %v268_v9, %v834_v0  ;;  %v273_v12 = vstv %s481_s30  ;;  %v261_v13 = vadd.f32 %v260_v7, %v258_v3  ;;  %v271_v14 = vmul.f32 %v840_v2, %v270_v11 }
  0x46   : > { %s860_s21 = sld [smem:[#allocation2 + $0x282]]  ;;  %s862_s23 = sld [smem:[#allocation2 + $0x300]]  ;;  %v274_v15 = vmul.f32 %v847_v4, %v273_v12  ;;  %v280_v16 = vstv %s828_s7  ;;  %v282_v18 = vstv %s830_s27 }
  0x47   : > { %s867_s28 = sld [smem:[#allocation2 + $0x301]]  ;;  %v281_v17 = vmul.f32 %v280_v16, %v834_v0  ;;  %v285_v19 = vstv %s832_s8  ;;  %v264_v20 = vadd.f32 %v263_v8, %v261_v13  ;;  %v272_v21 = vadd.f32 %v271_v14, %v269_v10  ;;  %s874_s29 = sld [smem:[#allocation5]] }
  0x48   : > { %v283_v22 = vmul.f32 %v840_v2, %v282_v18  ;;  %v286_v23 = vmul.f32 %v847_v4, %v285_v19  ;;  %v292_v24 = vstv %s836_s9  ;;  %v294_v25 = vstv %s838_s10  ;;  %s880_s30 = sld [smem:[#allocation5 + $0x1]]  ;;  %s882_s6 = sld [smem:[#allocation5 + $0x2]] }
  0x49   : > { %v297_v26 = vstv %s843_s11  ;;  %v304_v27 = vstv %s845_s19  ;;  %v275_v28 = vadd.f32 %v274_v15, %v272_v21  ;;  %v293_v30 = vmul.f32 %v292_v24, %v834_v0  ;;  %s886_s7 = sld [smem:[#allocation5 + $0x3]]  ;;  %s888_s27 = sld [smem:[#allocation5 + $0x4]] }
  0x4a   : > { %v284_v29 = vadd.f32 %v283_v22, %v281_v17  ;;  %v295_v31 = vmul.f32 %v840_v2, %v294_v25  ;;  %v298_v32 = vmul.f32 %v847_v4, %v297_v26  ;;  %v305_v33 = vmul.f32 %v304_v27, %v834_v0  ;;  %s894_s8 = sld [smem:[#allocation2 + $0x302]]  ;;  %s896_s9 = sld [smem:[#allocation5 + $0x5]] }
  0x4b   : > { %v306_v34 = vstv %s849_s26  ;;  %v309_v35 = vstv %s851_s18  ;;  %s900_s10 = sld [smem:[#allocation2 + $0x380]]  ;;  %s902_s11 = sld [smem:[#allocation5 + $0x6]]  ;;  %v316_v40 = vstv %s855_s4  ;;  %v318_v41 = vstv %s857_s5 }
  0x4c   : > { %v287_v36 = vadd.f32 %v286_v23, %v284_v29  ;;  %v296_v37 = vadd.f32 %v295_v31, %v293_v30  ;;  %v307_v38 = vmul.f32 %v840_v2, %v306_v34  ;;  %v310_v39 = vmul.f32 %v847_v4, %v309_v35  ;;  %s908_s19 = sld [smem:[#allocation2 + $0x381]]  ;;  %s910_s26 = sld [smem:[#allocation2 + $0x382]] }
  0x4d   : > { %v321_v42 = vstv %s860_s21  ;;  %v328_v43 = vstv %s862_s23  ;;  %v317_v46 = vmul.f32 %v316_v40, %v834_v0  ;;  %v319_v47 = vmul.f32 %v840_v2, %v318_v41  ;;  %s922_s18 = sld [smem:[#allocation5 + $0x7]]  ;;  %s210_s4 = sand.u32 1, %s689_s13  }
  0x4e   : > { %v299_v44 = vadd.f32 %v298_v32, %v296_v37  ;;  %v308_v45 = vadd.f32 %v307_v38, %v305_v33  ;;  %v265_v48 = vstv %s874_s29  ;;  %v322_v49 = vmul.f32 %v847_v4, %v321_v42  ;;  %s509_s5 = sshll.u32 %s697_s15, 4  ;;  %s211_s21 = scalar_lea.vmem [#allocation7], %s210_s4 }
  0x4f   : > { %v329_v50 = vmul.f32 %v328_v43, %v834_v0  ;;  %v330_v51 = vstv %s867_s28  ;;  %v266_v52 = vadd.f32 %v265_v48, %v264_v20  ;;  %v276_v53 = vstv %s880_s30  ;;  %s375_s23 = sshll.u32 %s211_s21, 4  ;;  %s941_s30 = scalar_lea.hbm %s991_s3, %s509_s5  ;;  %s943_s23 = int_to_ptr.vmem [resolvable:$true] %s375_s23 }
  0x50   : > { %v288_v54 = vstv %s882_s6  ;;  %v311_v55 = vadd.f32 %v310_v39, %v308_v45  ;;  %v277_v56 = vadd.f32 %v276_v53, %v275_v28  ;;  %v300_v58 = vstv %s886_s7  ;;  %s362_s6 = scalar_lea.sflag [#allocation3], %s210_s4  ;;  %s619_s7 = scalar_lea.vmem %s943_s23, 16 }
  0x51   : > { %v289_v57 = vadd.f32 %v288_v54, %v287_v36  ;;  %v312_v59 = vstv %s888_s27  ;;  %v267_v60 = vmax.f32 %v266_v52, 0.0  ;;  %v301_v61 = vadd.f32 %v300_v58, %v299_v44  ;;  %p620_p8 = scmp.ne.s32.totalorder %s943_s23, %s619_s7  ;;  %p1003_p10 = scmp.ne.s32.totalorder %s996_s22, 0 }
  0x52   : > { %v313_v62 = vadd.f32 %v312_v59, %v311_v55  ;;  %v320_v63 = vadd.f32 %v319_v47, %v317_v46  ;;  %v278_v1 = vmax.f32 %v277_v56, 0.0  ;;  %v324_v5 = vstv %s896_s9  ;;  %s709_s15 = smov [#allocation7]  }
  0x53   : > { %v290_v3 = vmax.f32 %v289_v57, 0.0  ;;  %v331_v6 = vmul.f32 %v840_v2, %v330_v51  ;;  %v302_v7 = vmax.f32 %v301_v61, 0.0  ;;  %v333_v10 = vstv %s894_s8  ;;  %p621_p11 = pnand %p620_p8, %p1003_p10  ;;  %s623_s27 = sshll.u32 %s709_s15, 4  ;;  %s624_s27 = int_to_ptr.vmem [resolvable:$false] %s623_s27 }
  0x54   : > { %v314_v8 = vmax.f32 %v313_v62, 0.0  ;;  %v323_v9 = vadd.f32 %v322_v49, %v320_v63  ;;  %v279_v11 = vadd.f32 %v278_v1, %v267_v60  ;;  %v334_v13 = vmul.f32 %v847_v4, %v333_v10  ;;  %s625_s8 = scalar_lea.vmem %s624_s27, 32  ;;  %p626_p1 = scmp.lt.s32.totalorder %s943_s23, %s624_s27 }
  0x55   : > { %v332_v12 = vadd.f32 %v331_v6, %v329_v50  ;;  %v336_v14 = vstv %s902_s11  ;;  %v340_v16 = vstv %s900_s10  ;;  %v342_v17 = vstv %s908_s19  ;;  %p622_p13 = pneg %p621_p11  ;;  %p627_p6 = scmp.lt.s32.totalorder %s625_s8, %s619_s7 }
  0x56   : > { %v325_v15 = vadd.f32 %v324_v5, %v323_v9  ;;  %v345_v18 = vstv %s910_s26  ;;  %v291_v19 = vadd.f32 %v290_v3, %v279_v11  ;;  %v341_v21 = vmul.f32 %v340_v16, %v834_v0 }
  0x57   : > { %v335_v20 = vadd.f32 %v334_v13, %v332_v12  ;;  %v343_v22 = vmul.f32 %v840_v2, %v342_v17  ;;  %v346_v23 = vmul.f32 %v847_v4, %v345_v18  ;;  %v348_v28 = vstv %s922_s18  ;;  %p628_p7 = por %p627_p6, %p626_p1 }
  0x58   : > { %v303_v24 = vadd.f32 %v302_v7, %v291_v19  ;;  %v326_v25 = vmax.f32 %v325_v15, 0.0 }
  0x59   : > { %v337_v26 = vadd.f32 %v336_v14, %v335_v20  ;;  %v344_v27 = vadd.f32 %v343_v22, %v341_v21  ;;  %p629_p9 = pnand %p628_p7, %p622_p13 }
  0x5a   : > { %v315_v29 = vadd.f32 %v314_v8, %v303_v24 }
  0x5b   : > { %v338_v30 = vmax.f32 %v337_v26, 0.0  ;;  %v347_v31 = vadd.f32 %v346_v23, %v344_v27 }
  0x5c   : > { %v327_v32 = vadd.f32 %v326_v25, %v315_v29 }
  0x5d   : > { %v349_v33 = vadd.f32 %v348_v28, %v347_v31 }
  0x5e   : > { %v339_v34 = vadd.f32 %v338_v30, %v327_v32 }
  0x5f   : > { %v350_v35 = vmax.f32 %v349_v33, 0.0 }
  0x61   : > { %v351_v0 = vadd.f32 %v350_v35, %v339_v34 }
  0x63   : > { %v353_v36 = vsel %vm352_vm0, %v351_v0, 0.0 }
  0x64   : > { %v354_v2 = vrot.slane %v353_v36, 4 }
  0x66   : > { %v355_v4 = vadd.f32 %v354_v2, %v353_v36 }
  0x68   : > { %v356_v37 = vrot.slane %v355_v4, 2 }
  0x6a   : > { %v357_v38 = vadd.f32 %v356_v37, %v355_v4 }
  0x6c   : > { %v358_v39 = vrot.slane %v357_v38, 1 }
  0x6e   : > { %v359_v40 = vadd.f32 %v358_v39, %v357_v38 }
  0x70   : > { %360 = vst [vmem:[%s211_s21] sm:$0x1] %v359_v40 }
  0x71   : > { %632 = shalt.err (!%p629_p9)
}
  0x72   : > { %s633_s9 = scalar_lea.hbm %s941_s30, 16  ;;  %s637_s19 = scalar_lea.hbm %s991_s3, 32 }
  0x73   : > { %p634_p12 = scmp.ne.s32.totalorder %s941_s30, %s633_s9  ;;  %p638_p3 = scmp.lt.u32.totalorder %s941_s30, %s991_s3 }
  0x74   : > { %p639_p5 = scmp.lt.u32.totalorder %s637_s19, %s633_s9  ;;  %p641_p8 = scmp.lt.u32.totalorder %s633_s9, %s941_s30 }
  0x75   : > { %p635_p0 = pnand %p634_p12, %p1003_p10 }
  0x76   : > { %p640_p4 = por %p639_p5, %p638_p3 }
  0x77   : > { %p636_p2 = pneg %p635_p0 }
  0x78   : > { %p642_p11 = por %p641_p8, %p640_p4 }
  0x7a   : > { %p643_p13 = pnand %p642_p11, %p636_p2 }
  0x7c   : > { %646 = shalt.err (!%p643_p13)
}
  0x7d   : > { %521 = dma.vmem_to_hbm [thread:$0]  (%p1003_p10), %s943_s23, 16, %s941_s30, %s362_s6  }
  0x7e PF: > { %p538_p1 = scmp.ge.s32.totalorder %s705_s17, 2  ;;  %s387_s4 = sand.u32 1, %s685_s12  }
  0x7f   : > { %p1004_p6 = scmp.ne.s32.totalorder %s997_s24, 0  ;;  %s388_s5 = scalar_lea.sflag [#allocation3], %s387_s4 }
  0x81   : > { %p531_p7 = pnand %p538_p1, %p1004_p6 }
  0x83   : > { %680 = dma.done.wait (!%p531_p7), %s388_s5, 16  }
  0x84   : > { %682 = vsyncadd (!%p531_p7), %s388_s5, 4294967280  ;;  %s18_s17 = sadd.s32 1, %s705_s17   ;;  %s1005_s12 = smov %s689_s13 }
  0x85   : > { %p15_p9 = scmp.ge.s32.totalorder %s18_s17, 4   ;;  %s1006_s13 = smov %s693_s14 }
  0x86   : > { %s1007_s14 = smov %s783_s25  ;;  %s1008_s15 = smov %s701_s16 }
  0x87   : > { %s1009_s16 = smov %s1011_s20  ;;  %17 = sbr.rel (!%p15_p9) target bundleno = 6 (0x6), region = 78 }
  0x8e   :  { %392 = vsyncpa [#allocation3], 1 }
  0x8f   :  { %394 = vsyncpa [#allocation3 + $0x1], 1 }
  0x90   :  { %395 = vsyncpa [#allocation4], 1 }
  0x91   :  { %397 = vsyncpa [#allocation4 + $0x1], 1 }
  0x92   :  { %398 = vsyncpa [#allocation6], 1 }

</bundles_post_ra>
